<compile_context>
chip_gen: v5e
topology: v5e:2x2
jax: 0.10.0
libtpu: 0.0.40
codegen_flags: <defaults>
</compile_context>

<pallas_src>
import functools

import jax
import jax.numpy as jnp
from jax.experimental import pallas as pl
from jax.experimental.pallas import tpu as pltpu


def _fused_double_conv_kernel(x_ref, t1_ref, b1_ref, t2_ref, b2_ref, o_ref,
                              *, negative_slope):
    """Two fused (3x3 conv + folded-BN + LeakyReLU) blocks for one batch group.

    x_ref : (G, H, W*Cin)      bf16 lane-dense input rows
    t1_ref: (3*W*Cin, W*Cmid)  bf16 stacked per-dy Toeplitz conv weights (BN scale folded in)
    b1_ref: (1, W*Cmid)        f32 folded BN shift
    t2_ref: (3*W*Cmid, W*Cout) bf16
    b2_ref: (1, W*Cout)        f32
    o_ref : (G, H, W*Cout)     lane-dense output rows
    """
    f32 = jnp.float32

    def conv_bn_lrelu(x3, t_ref, b_ref):
        # x3: (G, H, L) f32.  One 3x3 conv (+ folded BN + LeakyReLU) as a single
        # K = 3*L matmul over an im2row slab with M = G*H rows.
        G, H, L = x3.shape
        zrow = jnp.zeros((G, 1, L), f32)
        above = jnp.concatenate([zrow, x3[:, :H - 1, :]], axis=1)   # image row h-1 (zero halo)
        below = jnp.concatenate([x3[:, 1:, :], zrow], axis=1)       # image row h+1 (zero halo)
        lhs = jnp.concatenate([above, x3, below], axis=-1)          # (G, H, 3L): dy = 0, 1, 2
        lhs = lhs.reshape(G * H, 3 * L).astype(t_ref.dtype)         # bf16 MXU operand
        acc = jnp.dot(lhs, t_ref[...], preferred_element_type=f32)  # (G*H, Lout) f32 accum
        y = acc + b_ref[...]                                        # BN shift (scale is in T)
        y = jnp.where(y >= 0, y, negative_slope * y)                # LeakyReLU
        return y.reshape(G, H, y.shape[-1])

    x0 = x_ref[...].astype(f32)
    y1 = conv_bn_lrelu(x0, t1_ref, b1_ref)     # block 1 (intermediate never hits HBM)
    y2 = conv_bn_lrelu(y1, t2_ref, b2_ref)     # block 2
    o_ref[...] = y2.astype(o_ref.dtype)        # full-lane (W*Cout wide) store


def _toeplitz_weights(w_oihw, W):
    """(Cout, Cin, 3, 3) conv weight -> per-dy Toeplitz matmul weights (3, W*Cin, W*Cout).

    T[dy, u*Cin+ci, w*Cout+co] = w[co, ci, dy, u-w+1] if 0 <= u-w+1 <= 2 else 0.
    Taps outside the image along W simply do not appear -> zero padding along W is encoded
    in the matrix; zero padding along H is the zero halo rows built inside the kernel.
    """
    c_out, c_in = w_oihw.shape[0], w_oihw.shape[1]
    w_hwio = jnp.transpose(w_oihw, (2, 3, 1, 0))            # (3, 3, Cin, Cout)
    u = jnp.arange(W)                                        # input column
    wo = jnp.arange(W)                                       # output column
    dx = u[:, None] - wo[None, :] + 1                        # (W, W) tap index
    valid = (dx >= 0) & (dx <= 2)
    t = w_hwio[:, jnp.clip(dx, 0, 2)]                        # (3, W, W, Cin, Cout)
    t = jnp.where(valid[None, :, :, None, None], t, 0.0)
    t = jnp.transpose(t, (0, 1, 3, 2, 4))                    # (3, W, Cin, W, Cout)
    return t.reshape(3, W * c_in, W * c_out).astype(jnp.float32)


def _fold_bn(gamma, beta, rmean, rvar, eps):
    inv_std = 1.0 / jnp.sqrt(rvar + eps)
    scale = gamma * inv_std
    shift = beta - rmean * scale
    return scale, shift


def prepare_multiple_conv_constants(params, W, eps=1e-5):
    """One-time (inference-constant) weight prep: stacked Toeplitz conv weights per block
    with the folded BN scale baked into the output lanes, plus the folded BN shift."""
    def build(p):
        t = _toeplitz_weights(p["w"], W)                               # (3, W*Cin, W*Cout)
        scale, shift = _fold_bn(p["gamma"], p["beta"],
                                p["running_mean"], p["running_var"], eps)
        t = t * jnp.tile(scale, W)[None, None, :]                      # fold BN scale into T
        t = t.reshape(t.shape[0] * t.shape[1], t.shape[2])             # stack dy along K
        b = jnp.tile(shift, W)[None, :].astype(jnp.float32)            # (1, W*Cout)
        return t.astype(jnp.bfloat16), b

    t1, b1 = build(params[0])
    t2, b2 = build(params[1])
    return t1, b1, t2, b2


@functools.partial(jax.jit, static_argnames=("negative_slope",))
def multiple_conv_forward(x_nchw, constants, negative_slope=0.01):
    """MultipleConv.forward (use_ffc=False, num_convs=2): fused two-block Pallas kernel."""
    t1, b1, t2, b2 = constants
    N, c_in, H, W = x_nchw.shape
    c_mid = b1.shape[-1] // W
    c_out = b2.shape[-1] // W
    assert t1.shape == (3 * W * c_in, W * c_mid), t1.shape
    assert t2.shape == (3 * W * c_mid, W * c_out), t2.shape

    # Layout change at entry: NCHW -> (N, H, W*Cin) lane-dense rows, bf16 MXU operand.
    # TODO(synk): keep the surrounding model NHWC to drop this HBM round trip.
    x_lane = jnp.transpose(x_nchw, (0, 2, 3, 1)).reshape(N, H, W * c_in).astype(jnp.bfloat16)

    # Batch grouping: 2 "parallel" grid steps (one per v7x TensorCore) only if each step
    # still gives an MXU-friendly M = (N/2)*H >= 128; otherwise a single big-M step.
    n_groups = 2 if (N % 2 == 0 and (N // 2) * H >= 128) else 1
    G = N // n_groups

    kernel = functools.partial(_fused_double_conv_kernel, negative_slope=negative_slope)

    flops = 2 * N * H * W * (3 * W * c_in * c_mid + 3 * W * c_mid * c_out)
    bytes_accessed = (x_lane.size * 2 + t1.size * 2 + t2.size * 2
                      + b1.size * 4 + b2.size * 4
                      + N * H * W * c_out * x_nchw.dtype.itemsize)

    out_lane = pl.pallas_call(
        kernel,
        out_shape=jax.ShapeDtypeStruct((N, H, W * c_out), x_nchw.dtype),
        grid_spec=pltpu.PrefetchScalarGridSpec(
            num_scalar_prefetch=0,
            grid=(n_groups,),
            in_specs=[
                pl.BlockSpec((G, H, W * c_in), lambda g: (g, 0, 0)),
                pl.BlockSpec((3 * W * c_in, W * c_mid), lambda g: (0, 0)),
                pl.BlockSpec((1, W * c_mid), lambda g: (0, 0)),
                pl.BlockSpec((3 * W * c_mid, W * c_out), lambda g: (0, 0)),
                pl.BlockSpec((1, W * c_out), lambda g: (0, 0)),
            ],
            out_specs=pl.BlockSpec((G, H, W * c_out), lambda g: (g, 0, 0)),
        ),
        compiler_params=pltpu.CompilerParams(dimension_semantics=("parallel",)),
        cost_estimate=pl.CostEstimate(flops=int(flops), transcendentals=0,
                                      bytes_accessed=int(bytes_accessed)),
    )(x_lane, t1, b1, t2, b2)

    # Layout change at exit: (N, H, W*Cout) -> NCHW.
    return jnp.transpose(out_lane.reshape(N, H, W, c_out), (0, 3, 1, 2))


# ------------------------------ test harness ------------------------------

def _reference_block(x, w, gamma, beta, rmean, rvar, eps=1e-5, ns=0.01):
    """Pure-JAX reference for one conv-bn-lrelu block (NCHW, f32)."""
    y = jax.lax.conv_general_dilated(
        x, w, window_strides=(1, 1), padding=((1, 1), (1, 1)),
        dimension_numbers=("NCHW", "OIHW", "NCHW"))
    inv_std = 1.0 / jnp.sqrt(rvar + eps)
    y = y * (gamma * inv_std)[None, :, None, None] + \
        (beta - rmean * gamma * inv_std)[None, :, None, None]
    return jnp.where(y >= 0, y, ns * y)


def _init_block_params(key, cin, cout):
    k_w, k_g, k_b, k_m, k_v = jax.random.split(key, 5)
    return {
        "w": (jax.random.normal(k_w, (cout, cin, 3, 3), jnp.float32) * 0.1),
        "gamma": 1.0 + 0.1 * jax.random.normal(k_g, (cout,), jnp.float32),
        "beta": 0.1 * jax.random.normal(k_b, (cout,), jnp.float32),
        "running_mean": 0.1 * jax.random.normal(k_m, (cout,), jnp.float32),
        "running_var": jax.random.uniform(k_v, (cout,), jnp.float32, 0.5, 1.5),
    }


if __name__ == "__main__":
    # Small shapes consistent with the module: batch=2, in_channels=4,
    # out_channels=8 (mid_channels defaults to out_channels), spatial=16.
    key = jax.random.PRNGKey(0)
    k_x, k_p1, k_p2 = jax.random.split(key, 3)

    B, C_IN, C_OUT, HW = 2, 4, 8, 16
    x = jax.random.normal(k_x, (B, C_IN, HW, HW), jnp.float32)

    params = [
        _init_block_params(k_p1, C_IN, C_OUT),   # conv block 1: in -> mid(=out)
        _init_block_params(k_p2, C_OUT, C_OUT),  # conv block 2: mid -> out
    ]

    # Inference-constant weight prep (done once, outside the per-forward path).
    constants = prepare_multiple_conv_constants(params, W=HW)

    out = jax.block_until_ready(multiple_conv_forward(x, constants))

    # Correctness check against pure-JAX f32 reference.
    ref = x
    for p in params:
        ref = _reference_block(ref, p["w"], p["gamma"], p["beta"],
                               p["running_mean"], p["running_var"])
    ref = jax.block_until_ready(ref)

    assert out.shape == (B, C_OUT, HW, HW), out.shape
    max_err = float(jnp.max(jnp.abs(out - ref)))
    # bf16 matmul operands (f32 accumulation) -> tolerance relaxed vs. the old f32 path.
    assert jnp.allclose(out, ref, atol=5e-2, rtol=5e-2), max_err

    print("KERNEL_OK")
</pallas_src>

<mosaic_0001>
module attributes {stable_mosaic.version = 11 : i64} {
  func.func @_fused_double_conv_kernel(%arg0: i32, %arg1: memref<2x16x64xbf16, #tpu.memory_space<vmem>>, %arg2: memref<192x128xbf16, #tpu.memory_space<vmem>>, %arg3: memref<1x128xf32, #tpu.memory_space<vmem>>, %arg4: memref<384x128xbf16, #tpu.memory_space<vmem>>, %arg5: memref<1x128xf32, #tpu.memory_space<vmem>>, %arg6: memref<2x16x128xf32, #tpu.memory_space<vmem>>) attributes {dimension_semantics = [#tpu.dimension_semantics<parallel>], iteration_bounds = array<i64: 1>, scalar_prefetch = 0 : i64, scratch_operands = 0 : i64, tpu.core_type = #tpu.core_type<tc>, window_params = [{transform_indices = @transform_0, window_bounds = array<i64: 2, 16, 64>}, {pipeline_mode = #tpu.pipeline_mode<synchronous>, transform_indices = @transform_1, window_bounds = array<i64: 192, 128>}, {pipeline_mode = #tpu.pipeline_mode<synchronous>, transform_indices = @transform_2, window_bounds = array<i64: 1, 128>}, {pipeline_mode = #tpu.pipeline_mode<synchronous>, transform_indices = @transform_3, window_bounds = array<i64: 384, 128>}, {pipeline_mode = #tpu.pipeline_mode<synchronous>, transform_indices = @transform_4, window_bounds = array<i64: 1, 128>}, {transform_indices = @transform_5, window_bounds = array<i64: 2, 16, 128>}]} {
    %c0 = arith.constant 0 : index
    %c0_0 = arith.constant 0 : index
    %c0_1 = arith.constant 0 : index
    %0 = vector.load %arg1[%c0, %c0_0, %c0_1] : memref<2x16x64xbf16, #tpu.memory_space<vmem>>, vector<2x16x64xbf16>
    %1 = arith.extf %0 : vector<2x16x64xbf16> to vector<2x16x64xf32>
    %cst = arith.constant 0.000000e+00 : f32
    %2 = vector.broadcast %cst : f32 to vector<2x1x64xf32>
    %3 = vector.extract_strided_slice %1 {offsets = [0, 0, 0], sizes = [2, 15, 64], strides = [1, 1, 1]} : vector<2x16x64xf32> to vector<2x15x64xf32>
    %4 = tpu.concatenate %2, %3 in 1 : vector<2x1x64xf32>, vector<2x15x64xf32> -> vector<2x16x64xf32>
    %5 = vector.extract_strided_slice %1 {offsets = [0, 1, 0], sizes = [2, 15, 64], strides = [1, 1, 1]} : vector<2x16x64xf32> to vector<2x15x64xf32>
    %6 = tpu.concatenate %5, %2 in 1 : vector<2x15x64xf32>, vector<2x1x64xf32> -> vector<2x16x64xf32>
    %7 = tpu.concatenate %4, %1, %6 in 2 : vector<2x16x64xf32>, vector<2x16x64xf32>, vector<2x16x64xf32> -> vector<2x16x192xf32>
    %8 = vector.shape_cast %7 : vector<2x16x192xf32> to vector<32x192xf32>
    %9 = arith.truncf %8 : vector<32x192xf32> to vector<32x192xbf16>
    %c0_2 = arith.constant 0 : index
    %c0_3 = arith.constant 0 : index
    %10 = vector.load %arg2[%c0_2, %c0_3] : memref<192x128xbf16, #tpu.memory_space<vmem>>, vector<192x128xbf16>
    %cst_4 = arith.constant dense<0.000000e+00> : vector<32x128xf32>
    %11 = tpu.matmul %9, %10, %cst_4 {dimension_numbers = #tpu.dot_dimension_numbers<[1], [0], [0], [1], [0, 0, 1, 1], [], []>} : vector<32x192xbf16>, vector<192x128xbf16>, vector<32x128xf32> -> vector<32x128xf32>
    %c0_5 = arith.constant 0 : index
    %c0_6 = arith.constant 0 : index
    %12 = vector.load %arg3[%c0_5, %c0_6] : memref<1x128xf32, #tpu.memory_space<vmem>>, vector<1x128xf32>
    %13 = vector.broadcast %12 : vector<1x128xf32> to vector<32x128xf32>
    %14 = arith.addf %11, %13 : vector<32x128xf32>
    %cst_7 = arith.constant 0.000000e+00 : f32
    %15 = vector.broadcast %cst_7 : f32 to vector<32x128xf32>
    %16 = arith.cmpf oge, %14, %15 : vector<32x128xf32>
    %cst_8 = arith.constant 0.00999999977 : f32
    %17 = vector.broadcast %cst_8 : f32 to vector<32x128xf32>
    %18 = arith.mulf %17, %14 : vector<32x128xf32>
    %19 = arith.select %16, %14, %18 : vector<32x128xi1>, vector<32x128xf32>
    %20 = vector.shape_cast %19 : vector<32x128xf32> to vector<2x16x128xf32>
    %cst_9 = arith.constant 0.000000e+00 : f32
    %21 = vector.broadcast %cst_9 : f32 to vector<2x1x128xf32>
    %22 = vector.extract_strided_slice %20 {offsets = [0, 0, 0], sizes = [2, 15, 128], strides = [1, 1, 1]} : vector<2x16x128xf32> to vector<2x15x128xf32>
    %23 = tpu.concatenate %21, %22 in 1 : vector<2x1x128xf32>, vector<2x15x128xf32> -> vector<2x16x128xf32>
    %24 = vector.extract_strided_slice %20 {offsets = [0, 1, 0], sizes = [2, 15, 128], strides = [1, 1, 1]} : vector<2x16x128xf32> to vector<2x15x128xf32>
    %25 = tpu.concatenate %24, %21 in 1 : vector<2x15x128xf32>, vector<2x1x128xf32> -> vector<2x16x128xf32>
    %26 = tpu.concatenate %23, %20, %25 in 2 : vector<2x16x128xf32>, vector<2x16x128xf32>, vector<2x16x128xf32> -> vector<2x16x384xf32>
    %27 = vector.shape_cast %26 : vector<2x16x384xf32> to vector<32x384xf32>
    %28 = arith.truncf %27 : vector<32x384xf32> to vector<32x384xbf16>
    %c0_10 = arith.constant 0 : index
    %c0_11 = arith.constant 0 : index
    %29 = vector.load %arg4[%c0_10, %c0_11] : memref<384x128xbf16, #tpu.memory_space<vmem>>, vector<384x128xbf16>
    %cst_12 = arith.constant dense<0.000000e+00> : vector<32x128xf32>
    %30 = tpu.matmul %28, %29, %cst_12 {dimension_numbers = #tpu.dot_dimension_numbers<[1], [0], [0], [1], [0, 0, 1, 1], [], []>} : vector<32x384xbf16>, vector<384x128xbf16>, vector<32x128xf32> -> vector<32x128xf32>
    %c0_13 = arith.constant 0 : index
    %c0_14 = arith.constant 0 : index
    %31 = vector.load %arg5[%c0_13, %c0_14] : memref<1x128xf32, #tpu.memory_space<vmem>>, vector<1x128xf32>
    %32 = vector.broadcast %31 : vector<1x128xf32> to vector<32x128xf32>
    %33 = arith.addf %30, %32 : vector<32x128xf32>
    %cst_15 = arith.constant 0.000000e+00 : f32
    %34 = vector.broadcast %cst_15 : f32 to vector<32x128xf32>
    %35 = arith.cmpf oge, %33, %34 : vector<32x128xf32>
    %cst_16 = arith.constant 0.00999999977 : f32
    %36 = vector.broadcast %cst_16 : f32 to vector<32x128xf32>
    %37 = arith.mulf %36, %33 : vector<32x128xf32>
    %38 = arith.select %35, %33, %37 : vector<32x128xi1>, vector<32x128xf32>
    %39 = vector.shape_cast %38 : vector<32x128xf32> to vector<2x16x128xf32>
    %c0_17 = arith.constant 0 : index
    %c0_18 = arith.constant 0 : index
    %c0_19 = arith.constant 0 : index
    %40 = vector.load %arg6[%c0_17, %c0_18, %c0_19] : memref<2x16x128xf32, #tpu.memory_space<vmem>>, vector<2x16x128xf32>
    tpu.vector_store %arg6[%c0_17, %c0_18, %c0_19], %39 {strides = array<i32>} : memref<2x16x128xf32, #tpu.memory_space<vmem>>, vector<2x16x128xf32>,
    return
  }
  func.func @transform_0(%arg0: i32) -> (i32, i32, i32) {
    %c0_i32 = arith.constant 0 : i32
    %c0_i32_0 = arith.constant 0 : i32
    %c0_i32_1 = arith.constant 0 : i32
    return %arg0, %c0_i32, %c0_i32_0 : i32, i32, i32
  }
  func.func @transform_1(%arg0: i32) -> (i32, i32) {
    %c0_i32 = arith.constant 0 : i32
    %c0_i32_0 = arith.constant 0 : i32
    %c0_i32_1 = arith.constant 0 : i32
    return %c0_i32, %c0_i32_0 : i32, i32
  }
  func.func @transform_2(%arg0: i32) -> (i32, i32) {
    %c0_i32 = arith.constant 0 : i32
    %c0_i32_0 = arith.constant 0 : i32
    %c0_i32_1 = arith.constant 0 : i32
    return %c0_i32, %c0_i32_0 : i32, i32
  }
  func.func @transform_3(%arg0: i32) -> (i32, i32) {
    %c0_i32 = arith.constant 0 : i32
    %c0_i32_0 = arith.constant 0 : i32
    %c0_i32_1 = arith.constant 0 : i32
    return %c0_i32, %c0_i32_0 : i32, i32
  }
  func.func @transform_4(%arg0: i32) -> (i32, i32) {
    %c0_i32 = arith.constant 0 : i32
    %c0_i32_0 = arith.constant 0 : i32
    %c0_i32_1 = arith.constant 0 : i32
    return %c0_i32, %c0_i32_0 : i32, i32
  }
  func.func @transform_5(%arg0: i32) -> (i32, i32, i32) {
    %c0_i32 = arith.constant 0 : i32
    %c0_i32_0 = arith.constant 0 : i32
    %c0_i32_1 = arith.constant 0 : i32
    return %arg0, %c0_i32, %c0_i32_0 : i32, i32, i32
  }
}

</mosaic_0001>

<bundles_post_ra>
// kernel: multiple_conv_forward.1
= control target key start
LH: loop header
LB: loop body
LE: loop exit
PB: predicated region body
PF: predicated region fallthrough
CT: control target
= control target key end

     0   :  { %s762_s30 = smov 64   ;;  %vm46_vm0 = vcmask 1046528   ;;  %vm71_vm1 = vcmask 523264   ;;  %vm33_vm2 = vcmask 1040384   ;;  %vm763_vm6 = vmmov 1   ;;  %s977_s0 = inlined_call_operand.vmem [shape: bf16[2,16,64], index: 0, kind: input, shape index: {}]   ;;  %s978_s1 = inlined_call_operand.vmem [shape: bf16[192,128], index: 1, kind: input, shape index: {}]   ;;  %s979_s2 = inlined_call_operand.vmem [shape: f32[1,128], index: 2, kind: input, shape index: {}]   ;;  %s980_s3 = inlined_call_operand.vmem [shape: bf16[384,128], index: 3, kind: input, shape index: {}]   ;;  %s981_s4 = inlined_call_operand.vmem [shape: f32[1,128], index: 4, kind: input, shape index: {}]   ;;  %s982_s5 = inlined_call_operand.vmem [shape: f32[2,16,128], index: 5, kind: output, shape index: {}]  }
   0x1   :  { %v740_v0 = vld [vmem:[%s977_s0] sm:$0xff]   ;;  %v710_v1 = vld [vmem:[%s978_s1 + $0x38] sm:$0xff]  ;;  %v747_v5 = vld [vmem:[%s977_s0 + $0x8] sm:$0xff]  }
   0x2   :  { %v800_v2 = vunpack.c.l.bf16 %v740_v0  ;;  %v742_v3 = vunpack.c.h.bf16 %v740_v0  ;;  %v714_v4 = vld [vmem:[%s978_s1 + $0x58] sm:$0xff]  ;;  %186 = vmatpush.bf16.msra.mxu0 %v710_v1  ;;  %v709_v6 = vld [vmem:[%s978_s1 + $0x30] sm:$0xff]  ;;  %v815_v9 = vunpack.c.l.bf16 %v747_v5  ;;  %v817_v10 = vunpack.c.h.bf16 %v747_v5  ;;  %v708_v11 = vld [vmem:[%s978_s1 + $0x28] sm:$0xff] }
   0x3   :  { %209 = vmatpush.bf16.msra.mxu1 %v714_v4  ;;  %v713_v8 = vld [vmem:[%s978_s1 + $0x50] sm:$0xff]  ;;  %v712_v12 = vld [vmem:[%s978_s1 + $0x48] sm:$0xff]  ;;  %v707_v14 = vld [vmem:[%s978_s1 + $0x20] sm:$0xff] }
   0x4   :  { %v750_v7 = vpack.i.bf16 %v742_v3, %v800_v2  ;;  %v755_v13 = vpack.i.bf16 %v817_v10, %v815_v9  ;;  %v711_v15 = vld [vmem:[%s978_s1 + $0x40] sm:$0xff]  ;;  %v706_v16 = vld [vmem:[%s978_s1 + $0x18] sm:$0xff]  ;;  %v705_v17 = vld [vmem:[%s978_s1 + $0x10] sm:$0xff]  ;;  %v47_v19 = vrot.slane %v800_v2, 1  ;;  %v48_v20 = vrot.slane %v742_v3, 1 }
   0x5   :  { %v704_v18 = vld [vmem:[%s978_s1 + $0x8] sm:$0xff]  ;;  %v703_v24 = vld [vmem:[%s978_s1] sm:$0xff]  ;;  %v50_v25 = vrot.slane %v815_v9, 1  ;;  %v51_v26 = vrot.slane %v817_v10, 1  ;;  %v730_v30 = vld [vmem:[%s980_s3 + $0x78] sm:$0xff]  ;;  %v34_v34 = vrot.slane %v800_v2, 7 }
   0x6   :  { %751 = vrot.lane.b32.xlu0 %v750_v7, %s762_s30  ;;  %187 = vmatpush.bf16.msra.mxu0 %v709_v6  ;;  %v49_v21 = vsel %vm46_vm0, %v47_v19, %v48_v20  ;;  %v57_v22 = vsel %vm46_vm0, %v48_v20, 0.0  ;;  %v722_v31 = vld [vmem:[%s980_s3 + $0x38] sm:$0xff]  ;;  %v729_v33 = vld [vmem:[%s980_s3 + $0x70] sm:$0xff]  ;;  %v35_v35 = vrot.slane %v742_v3, 7  ;;  %v37_v45 = vrot.slane %v815_v9, 7  ;;  %v728_v56 = vld [vmem:[%s980_s3 + $0x68] sm:$0xff] }
   0x7   :  { %210 = vmatpush.bf16.msra.mxu1 %v713_v8  ;;  %v77_v23 = vpack.c.bf16 %v57_v22, %v49_v21  ;;  %v52_v27 = vsel %vm46_vm0, %v50_v25, %v51_v26  ;;  %v58_v28 = vsel %vm46_vm0, %v51_v26, 0.0  ;;  %v738_v32 = vld [vmem:[%s980_s3 + $0xb8] sm:$0xff]  ;;  %485 = vmatpush.bf16.msra.mxu3 %v730_v30  ;;  %v44_v38 = vsel %vm33_vm2, 0.0, %v34_v34  ;;  %v721_v54 = vld [vmem:[%s980_s3 + $0x30] sm:$0xff]  ;;  %v720_v57 = vld [vmem:[%s980_s3 + $0x28] sm:$0xff] }
   0x8   :  { %v79_v29 = vpack.c.bf16 %v58_v28, %v52_v27  ;;  %466 = vmatpush.bf16.msra.mxu2 %v722_v31  ;;  %v36_v37 = vsel %vm33_vm2, %v34_v34, %v35_v35  ;;  %v38_v46 = vrot.slane %v817_v10, 7  ;;  %v45_v50 = vsel %vm33_vm2, 0.0, %v37_v45  ;;  %v737_v55 = vld [vmem:[%s980_s3 + $0xb0] sm:$0xff]  ;;  %v736_v58 = vld [vmem:[%s980_s3 + $0xa8] sm:$0xff]  ;;  %v727_v59 = vld [vmem:[%s980_s3 + $0x60] sm:$0xff] }
   0x9   :  { %v719_v60 = vld [vmem:[%s980_s3 + $0x20] sm:$0xff]  ;;  %v726_v62 = vld [vmem:[%s980_s3 + $0x58] sm:$0xff]  ;;  %v725_v1 = vld [vmem:[%s980_s3 + $0x50] sm:$0xff] }
   0xa   :  { %188 = vmatpush.bf16.msra.mxu0 %v708_v11  ;;  %v39_v49 = vsel %vm33_vm2, %v37_v45, %v38_v46  ;;  %v735_v61 = vld [vmem:[%s980_s3 + $0xa0] sm:$0xff]  ;;  %v718_v63 = vld [vmem:[%s980_s3 + $0x18] sm:$0xff]  ;;  %v717_v2 = vld [vmem:[%s980_s3 + $0x10] sm:$0xff] }
   0xb   :  { %211 = vmatpush.bf16.msra.mxu1 %v712_v12  ;;  %486 = vmatpush.bf16.msra.mxu3 %v729_v33  ;;  %v734_v0 = vld [vmem:[%s980_s3 + $0x98] sm:$0xff]  ;;  %v733_v3 = vld [vmem:[%s980_s3 + $0x90] sm:$0xff]  ;;  %v724_v4 = vld [vmem:[%s980_s3 + $0x48] sm:$0xff] }
   0xc   :  { %467 = vmatpush.bf16.msra.mxu2 %v721_v54  ;;  %v716_v5 = vld [vmem:[%s980_s3 + $0x8] sm:$0xff]  ;;  %v723_v7 = vld [vmem:[%s980_s3 + $0x40] sm:$0xff]  ;;  %vm689_vm5 = vmneg %vm33_vm2 }
   0xd   :  { %v732_v6 = vld [vmem:[%s980_s3 + $0x88] sm:$0xff]  ;;  %v715_v8 = vld [vmem:[%s980_s3] sm:$0xff]  ;;  %vm941_vm7 = vmpackc.low %vm763_vm6, %vm689_vm5 }
   0xe   :  { %756 = vrot.lane.b32.xlu0 %v755_v13, %s762_s30  ;;  %189 = vmatpush.bf16.msra.mxu0 %v707_v14  ;;  %v731_v9 = vld [vmem:[%s980_s3 + $0x80] sm:$0xff]  ;;  %vm948_vm8 = vmpackc.low %vm46_vm0, %vm763_vm6 }
   0xf   :  { %212 = vmatpush.bf16.msra.mxu1 %v711_v15  ;;  %487 = vmatpush.bf16.msra.mxu3 %v728_v56  ;;  %v760_v11 = vld [vmem:[%s979_s2] ss:$0 sm:$0xff] }
  0x10   :  { %468 = vmatpush.bf16.msra.mxu2 %v720_v57  ;;  %v761_v56 = vld [vmem:[%s981_s4] ss:$0 sm:$0xff] }
  0x12   :  { %190 = vmatpush.bf16.msra.mxu0 %v706_v16  ;;  %591 = vmatmul.msk.bf16.vlgmr.msra.gmra.mxu1 %vm71_vm1, %v77_v23 }
  0x13   :  { %504 = vmatpush.bf16.msrb.mxu1 %v738_v32  ;;  %488 = vmatpush.bf16.msra.mxu3 %v727_v59 }
  0x14   :  { %469 = vmatpush.bf16.msra.mxu2 %v719_v60 }
  0x16   :  { %191 = vmatpush.bf16.msra.mxu0 %v705_v17 }
  0x17   :  { %505 = vmatpush.bf16.msrb.mxu1 %v737_v55  ;;  %489 = vmatpush.bf16.msra.mxu3 %v726_v62 }
  0x18   :  { %470 = vmatpush.bf16.msra.mxu2 %v718_v63 }
  0x1a   :  { %192 = vmatpush.bf16.msra.mxu0 %v704_v18 }
  0x1b   :  { %506 = vmatpush.bf16.msrb.mxu1 %v736_v58  ;;  %490 = vmatpush.bf16.msra.mxu3 %v725_v1 }
  0x1c   :  { %471 = vmatpush.bf16.msra.mxu2 %v717_v2 }
  0x1e   :  { %193 = vmatpush.bf16.msra.mxu0 %v703_v24 }
  0x1f   :  { %507 = vmatpush.bf16.msrb.mxu1 %v735_v61  ;;  %491 = vmatpush.bf16.msra.mxu3 %v724_v4 }
  0x20   :  { %472 = vmatpush.bf16.msra.mxu2 %v716_v5 }
  0x22   :  { %592 = vmatmul.msk.bf16.gmra.mxu1 %vm71_vm1, %v79_v29 }
  0x23   :  { %508 = vmatpush.bf16.msrb.mxu1 %v734_v0  ;;  %492 = vmatpush.bf16.msra.mxu3 %v723_v7 }
  0x24   :  { %473 = vmatpush.bf16.msra.mxu2 %v715_v8 }
  0x27   :  { %509 = vmatpush.bf16.msrb.mxu1 %v733_v3 }
  0x2b   :  { %510 = vmatpush.bf16.msrb.mxu1 %v732_v6 }
  0x2f   :  { %511 = vmatpush.bf16.msrb.mxu1 %v731_v9 }
  0x78   :  { %v752_v36 = vpop.permute.xlu0 %751 }
  0x79   :  { %v754_v39 = vunpack.i.h.bf16 %v752_v36  ;;  %v753_v40 = vunpack.i.l.bf16 %v752_v36 }
  0x7b   :  { %v72_v41 = vsel %vm71_vm1, %v44_v38, %v753_v40  ;;  %v73_v42 = vsel %vm71_vm1, %v36_v37, %v754_v39 }
  0x7c   :  { %v76_v43 = vpack.c.bf16 %v73_v42, %v72_v41 }
  0x7e   :  { %194 = vmatmul.bf16.vlgmr.msra.gmra.mxu0 %v76_v43 }
  0x80   :  { %v757_v44 = vpop.permute.xlu0 %756 }
  0x81   :  { %v759_v47 = vunpack.i.h.bf16 %v757_v44  ;;  %v758_v48 = vunpack.i.l.bf16 %v757_v44 }
  0x83   :  { %v74_v51 = vsel %vm71_vm1, %v45_v50, %v758_v48  ;;  %v75_v52 = vsel %vm71_vm1, %v39_v49, %v759_v47 }
  0x84   :  { %v78_v53 = vpack.c.bf16 %v75_v52, %v74_v51 }
  0x8e   :  { %199 = vmatmul.bf16.gmra.mxu0 %v78_v53 }
  0x8f   :  { %v214_v10 = vpop.f32.mrf.mxu1 }
  0x97   :  { %v216_v15 = vpop.f32.mrf.mxu1 }
  0x9f   :  { %v219_v24 = vpop.f32.mrf.mxu1 }
  0xa7   :  { %v221_v41 = vpop.f32.mrf.mxu1 }
  0xfb   :  { %v195_v12 = vpop.f32.mrf.mxu0 }
  0xfc   :  { %v196_v13 = vadd.f32 %v760_v11, %v195_v12 }
  0xfe   :  { %v215_v14 = vadd.f32 %v214_v10, %v196_v13 }
 0x100   :  { %v228_v16 = vmul.f32 0.01, %v215_v14  ;;  %vm224_vm3 = vcmp.ge.f32.partialorder %v215_v14, 0.0 }
 0x102   :  { %v232_v20 = vsel %vm224_vm3, %v215_v14, %v228_v16 }
 0x103   :  { %v197_v17 = vpop.f32.mrf.mxu0  ;;  %v252_v23 = vrot.slane %v232_v20, 1  ;;  %v240_v29 = vrot.slane %v232_v20, 7 }
 0x104   :  { %v198_v18 = vadd.f32 %v760_v11, %v197_v17 }
 0x106   :  { %v217_v19 = vadd.f32 %v216_v15, %v198_v18 }
 0x108   :  { %v229_v21 = vmul.f32 0.01, %v217_v19  ;;  %vm225_vm4 = vcmp.ge.f32.partialorder %v217_v19, 0.0 }
 0x10a   :  { %v233_v22 = vsel %vm225_vm4, %v217_v19, %v229_v21 }
 0x10b   :  { %v200_v25 = vpop.f32.mrf.mxu0  ;;  %v241_v26 = vrot.slane %v233_v22, 7  ;;  %v253_v27 = vrot.slane %v233_v22, 1  ;;  %v265_v28 = vpack.c.bf16 %v233_v22, %v232_v20 }
 0x10c   :  { %v201_v30 = vadd.f32 %v760_v11, %v200_v25 }
 0x10d   :  { %493 = vmatmul.bf16.vlgmr.msra.gmra.mxu3 %v265_v28  ;;  %v242_v32 = vsel %vm33_vm2, %v240_v29, %v241_v26  ;;  %v254_v33 = vsel %vm46_vm0, %v252_v23, %v253_v27 }
 0x10e   :  { %v691_v35 = vpack.c.bf16 %v242_v32, %v240_v29  ;;  %v698_v36 = vpack.c.bf16 %v253_v27, %v254_v33  ;;  %v220_v37 = vadd.f32 %v219_v24, %v201_v30 }
 0x110   :  { %692 = vmatmul.msk.bf16.vlgmr.msra.gmra.mxu2 %vm941_vm7, %v691_v35  ;;  %699 = vmatmul.msk.bf16.vlgmr.msrb.gmra.mxu1 %vm948_vm8, %v698_v36  ;;  %v230_v38 = vmul.f32 0.01, %v220_v37  ;;  %vm226_vm9 = vcmp.ge.f32.partialorder %v220_v37, 0.0 }
 0x112   :  { %v234_v43 = vsel %vm226_vm9, %v220_v37, %v230_v38 }
 0x113   :  { %v202_v39 = vpop.f32.mrf.mxu0  ;;  %v255_v46 = vrot.slane %v234_v43, 1  ;;  %v243_v49 = vrot.slane %v234_v43, 7 }
 0x114   :  { %v203_v40 = vadd.f32 %v760_v11, %v202_v39 }
 0x116   :  { %v222_v42 = vadd.f32 %v221_v41, %v203_v40 }
 0x118   :  { %v231_v44 = vmul.f32 0.01, %v222_v42  ;;  %vm227_vm10 = vcmp.ge.f32.partialorder %v222_v42, 0.0 }
 0x11a   :  { %v235_v45 = vsel %vm227_vm10, %v222_v42, %v231_v44 }
 0x11b   :  { %v244_v47 = vrot.slane %v235_v45, 7  ;;  %v268_v48 = vpack.c.bf16 %v235_v45, %v234_v43  ;;  %v256_v50 = vrot.slane %v235_v45, 1 }
 0x11d   :  { %498 = vmatmul.bf16.gmra.mxu3 %v268_v48  ;;  %v245_v51 = vsel %vm33_vm2, %v243_v49, %v244_v47  ;;  %v257_v52 = vsel %vm46_vm0, %v255_v46, %v256_v50 }
 0x11e   :  { %v695_v53 = vpack.c.bf16 %v245_v51, %v243_v49  ;;  %v701_v54 = vpack.c.bf16 %v256_v50, %v257_v52 }
 0x120   :  { %696 = vmatmul.msk.bf16.gmra.mxu2 %vm941_vm7, %v695_v53  ;;  %702 = vmatmul.msk.bf16.gmra.mxu1 %vm948_vm8, %v701_v54 }
 0x18d   :  { %v513_v57 = vpop.f32.mrf.mxu1 }
 0x190   :  { %v494_v55 = vpop.f32.mrf.mxu3 }
 0x193   :  { %v475_v58 = vpop.f32.mrf.mxu2 }
 0x194   :  { %v476_v59 = vadd.f32 %v761_v56, %v475_v58 }
 0x195   :  { %v515_v0 = vpop.f32.mrf.mxu1 }
 0x196   :  { %v495_v60 = vadd.f32 %v494_v55, %v476_v59 }
 0x198   :  { %v514_v61 = vadd.f32 %v513_v57, %v495_v60  ;;  %v496_v62 = vpop.f32.mrf.mxu3 }
 0x19a   :  { %vm523_vm11 = vcmp.ge.f32.partialorder %v514_v61, 0.0  ;;  %v527_v63 = vmul.f32 0.01, %v514_v61 }
 0x19b   :  { %v477_v1 = vpop.f32.mrf.mxu2 }
 0x19c   :  { %v531_v2 = vsel %vm523_vm11, %v514_v61, %v527_v63  ;;  %v478_v3 = vadd.f32 %v761_v56, %v477_v1 }
 0x19d   :  { %535 = vst [vmem:[%s982_s5] sm:$0xff] %v531_v2  ;;  %v518_v11 = vpop.f32.mrf.mxu1 }
 0x19e   :  { %v497_v4 = vadd.f32 %v496_v62, %v478_v3 }
 0x1a0   :  { %v516_v5 = vadd.f32 %v515_v0, %v497_v4  ;;  %v499_v7 = vpop.f32.mrf.mxu3 }
 0x1a2   :  { %vm524_vm12 = vcmp.ge.f32.partialorder %v516_v5, 0.0  ;;  %v528_v6 = vmul.f32 0.01, %v516_v5 }
 0x1a3   :  { %v480_v8 = vpop.f32.mrf.mxu2 }
 0x1a4   :  { %v532_v9 = vsel %vm524_vm12, %v516_v5, %v528_v6  ;;  %v481_v10 = vadd.f32 %v761_v56, %v480_v8 }
 0x1a5   :  { %536 = vst [vmem:[%s982_s5 + $0x8] sm:$0xff] %v532_v9  ;;  %v520_v20 = vpop.f32.mrf.mxu1 }
 0x1a6   :  { %v500_v12 = vadd.f32 %v499_v7, %v481_v10 }
 0x1a8   :  { %v519_v13 = vadd.f32 %v518_v11, %v500_v12  ;;  %v501_v18 = vpop.f32.mrf.mxu3 }
 0x1aa   :  { %vm525_vm13 = vcmp.ge.f32.partialorder %v519_v13, 0.0  ;;  %v529_v14 = vmul.f32 0.01, %v519_v13 }
 0x1ab   :  { %v482_v15 = vpop.f32.mrf.mxu2 }
 0x1ac   :  { %v533_v16 = vsel %vm525_vm13, %v519_v13, %v529_v14  ;;  %v483_v17 = vadd.f32 %v761_v56, %v482_v15 }
 0x1ad   :  { %537 = vst [vmem:[%s982_s5 + $0x10] sm:$0xff] %v533_v16 }
 0x1ae   :  { %v502_v19 = vadd.f32 %v501_v18, %v483_v17 }
 0x1b0   :  { %v521_v21 = vadd.f32 %v520_v20, %v502_v19 }
 0x1b2   :  { %vm526_vm14 = vcmp.ge.f32.partialorder %v521_v21, 0.0  ;;  %v530_v22 = vmul.f32 0.01, %v521_v21 }
 0x1b4   :  { %v534_v23 = vsel %vm526_vm14, %v521_v21, %v530_v22 }
 0x1b5   :  { %538 = vst [vmem:[%s982_s5 + $0x18] sm:$0xff] %v534_v23 }

</bundles_post_ra>
